<compile_context>
chip_gen: v7x
topology: tpu7x:2x2x1
jax: 0.10.0
libtpu: 0.0.40
codegen_flags: <defaults>
</compile_context>

<pallas_src>
import functools

import jax
import jax.numpy as jnp
from jax.experimental import pallas as pl
from jax.experimental.pallas import tpu as pltpu


def _reservoir_kernel(x_ref, win_t_ref, wl_t_ref, s0_ref,
                      spikes_ref, s_out_ref, state_scr,
                      *, num_layers, scale_factor, bias_val):
    # x_ref:      (1, B, D)        current timestep input block
    # win_t_ref:  (D, O_pad)       input weights, transposed + zero-padded
    # wl_t_ref:   (L, O_pad, O_pad) recurrent weights, transposed + padded
    # s0_ref:     (L, B, O_pad)    initial reservoir states (padded)
    # spikes_ref: (1, B, O_pad)    spike output for this timestep
    # s_out_ref:  (L, B, O_pad)    final reservoir states (written at last step)
    # state_scr:  (L, B, O_pad)    VMEM-resident recurrent state
    t = pl.program_id(0)

    @pl.when(t == 0)
    def _init():
        state_scr[...] = s0_ref[...]

    # input_mapped = (scale * x) @ W_in^T        -> MXU
    x_t = x_ref[0] * scale_factor
    acc = jnp.dot(x_t, win_t_ref[...], preferred_element_type=jnp.float32)

    # Recurrent layers: state_i = tanh(state_i @ W_i^T); accumulate sum.
    for i in range(num_layers):            # small static L -> unrolled
        new_s = jnp.tanh(jnp.dot(state_scr[i], wl_t_ref[i],
                                 preferred_element_type=jnp.float32))
        state_scr[i] = new_s
        acc = acc + new_s

    final = jnp.tanh(acc) + bias_val
    # torch.heaviside(final, 0.0): 1.0 where >0, 0.0 where <=0 (0 at exactly 0).
    spikes_ref[0] = jnp.where(final > 0, 1.0, 0.0).astype(spikes_ref.dtype)

    @pl.when(t == pl.num_programs(0) - 1)
    def _finalize():
        s_out_ref[...] = state_scr[...]


def step_by_step_hierarchical_reservoir(x_seq, win_t, wl_t, init_states,
                                        output_size, *,
                                        scale_factor=10.0, bias=0.1):
    """Run the reservoir over a whole sequence in one pallas_call.

    x_seq:       (T, B, D) float32
    win_t:       (D, O_pad) float32   padded transposed input weights
    wl_t:        (L, O_pad, O_pad) float32 padded transposed recurrent weights
    init_states: (L, B, output_size) float32 initial reservoir states
    Returns (spikes (T, B, output_size), final_states (L, B, output_size)).
    """
    T, B, D = x_seq.shape
    D2, O_pad = win_t.shape
    L = wl_t.shape[0]
    assert D == D2 and wl_t.shape[1:] == (O_pad, O_pad)
    assert init_states.shape == (L, B, output_size)

    # Pad initial states to the lane-dense width (padded columns stay 0).
    s0 = jnp.zeros((L, B, O_pad), jnp.float32).at[:, :, :output_size].set(
        init_states.astype(jnp.float32))

    kernel = functools.partial(_reservoir_kernel, num_layers=L,
                               scale_factor=float(scale_factor),
                               bias_val=float(bias))

    flops = T * (2 * B * D * O_pad + L * 2 * B * O_pad * O_pad)
    transcendentals = T * (L + 1) * B * O_pad
    bytes_accessed = 4 * (x_seq.size + win_t.size + wl_t.size + s0.size
                          + T * B * O_pad + L * B * O_pad)

    spikes_pad, states_pad = pl.pallas_call(
        kernel,
        out_shape=(jax.ShapeDtypeStruct((T, B, O_pad), jnp.float32),
                   jax.ShapeDtypeStruct((L, B, O_pad), jnp.float32)),
        grid=(T,),
        in_specs=[
            pl.BlockSpec((1, B, D), lambda t: (t, 0, 0)),          # x_t streams
            pl.BlockSpec((D, O_pad), lambda t: (0, 0)),            # W_in resident
            pl.BlockSpec((L, O_pad, O_pad), lambda t: (0, 0, 0)),  # W_i resident
            pl.BlockSpec((L, B, O_pad), lambda t: (0, 0, 0)),      # init states
        ],
        out_specs=(
            pl.BlockSpec((1, B, O_pad), lambda t: (t, 0, 0)),      # spikes
            pl.BlockSpec((L, B, O_pad), lambda t: (0, 0, 0)),      # final states
        ),
        scratch_shapes=[pltpu.VMEM((L, B, O_pad), jnp.float32)],
        compiler_params=pltpu.CompilerParams(
            dimension_semantics=("arbitrary",)),                   # recurrence
        cost_estimate=pl.CostEstimate(flops=flops,
                                      transcendentals=transcendentals,
                                      bytes_accessed=bytes_accessed),
    )(x_seq, win_t, wl_t, s0)

    return spikes_pad[:, :, :output_size], states_pad[:, :, :output_size]


def make_weights(key, input_size, output_size, num_layers, o_pad):
    """Mimic the PyTorch __init__: uniform(-2, 2) weights, no bias.
    Returns raw weights (for the reference) and padded transposed weights
    (for the kernel)."""
    k_in, k_l = jax.random.split(key)
    w_in = jax.random.uniform(k_in, (output_size, input_size),
                              minval=-2.0, maxval=2.0, dtype=jnp.float32)
    layer_keys = jax.random.split(k_l, num_layers)
    w_layers = jnp.stack([
        jax.random.uniform(k, (output_size, output_size),
                           minval=-2.0, maxval=2.0, dtype=jnp.float32)
        for k in layer_keys])
    win_t = jnp.zeros((input_size, o_pad), jnp.float32)
    win_t = win_t.at[:, :output_size].set(w_in.T)
    wl_t = jnp.zeros((num_layers, o_pad, o_pad), jnp.float32)
    wl_t = wl_t.at[:, :output_size, :output_size].set(
        jnp.transpose(w_layers, (0, 2, 1)))
    return w_in, w_layers, win_t, wl_t


def reference_forward_seq(x_seq, w_in, w_layers, init_states,
                          scale_factor, bias):
    """Pure-JAX replica of the PyTorch step-by-step forward over a sequence."""
    T = x_seq.shape[0]
    L = w_layers.shape[0]
    states = [init_states[i] for i in range(L)]
    spikes = []
    for t in range(T):
        x = x_seq[t] * scale_factor
        input_mapped = x @ w_in.T
        summed = jnp.zeros_like(input_mapped)
        for i in range(L):
            states[i] = jnp.tanh(states[i] @ w_layers[i].T)
            summed = summed + states[i]
        final = jnp.tanh(input_mapped + summed) + bias
        spikes.append(jnp.where(final > 0, 1.0, 0.0))
    return jnp.stack(spikes), jnp.stack(states)


if __name__ == "__main__":
    key = jax.random.PRNGKey(0)

    T, B = 16, 8
    input_size, output_size, num_layers = 32, 20, 3
    scale_factor, bias = 10.0, 0.1
    o_pad = ((output_size + 127) // 128) * 128   # lane-dense output width

    k_w, k_x, k_s = jax.random.split(key, 3)
    w_in, w_layers, win_t, wl_t = make_weights(k_w, input_size, output_size,
                                               num_layers, o_pad)
    x_seq = jax.random.normal(k_x, (T, B, input_size), dtype=jnp.float32)

    # Case 1: zero initial states (module right after reset_state).
    init0 = jnp.zeros((num_layers, B, output_size), jnp.float32)
    spikes0, final0 = step_by_step_hierarchical_reservoir(
        x_seq, win_t, wl_t, init0, output_size,
        scale_factor=scale_factor, bias=bias)
    spikes0 = jax.block_until_ready(spikes0)
    ref_spikes0, ref_states0 = reference_forward_seq(
        x_seq, w_in, w_layers, init0, scale_factor, bias)
    assert spikes0.shape == (T, B, output_size)
    assert jnp.allclose(spikes0, ref_spikes0), "spike mismatch (zero init)"
    assert jnp.allclose(final0, ref_states0, atol=1e-5), "state mismatch (zero init)"

    # Case 2: nonzero initial states — exercises the recurrent path.
    init1 = jax.random.uniform(k_s, (num_layers, B, output_size),
                               minval=-1.0, maxval=1.0, dtype=jnp.float32)
    spikes1, final1 = step_by_step_hierarchical_reservoir(
        x_seq, win_t, wl_t, init1, output_size,
        scale_factor=scale_factor, bias=bias)
    spikes1 = jax.block_until_ready(spikes1)
    ref_spikes1, ref_states1 = reference_forward_seq(
        x_seq, w_in, w_layers, init1, scale_factor, bias)
    assert jnp.allclose(spikes1, ref_spikes1), "spike mismatch (random init)"
    assert jnp.allclose(final1, ref_states1, atol=1e-5), "state mismatch (random init)"

    print("KERNEL_OK")
</pallas_src>

<mosaic_0001>
module attributes {stable_mosaic.version = 11 : i64} {
  func.func @_reservoir_kernel(%arg0: i32, %arg1: memref<1x8x32xf32, #tpu.memory_space<vmem>>, %arg2: memref<32x128xf32, #tpu.memory_space<vmem>>, %arg3: memref<3x128x128xf32, #tpu.memory_space<vmem>>, %arg4: memref<3x8x128xf32, #tpu.memory_space<vmem>>, %arg5: memref<1x8x128xf32, #tpu.memory_space<vmem>>, %arg6: memref<3x8x128xf32, #tpu.memory_space<vmem>>, %arg7: memref<3x8x128xf32, #tpu.memory_space<vmem>>) attributes {dimension_semantics = [#tpu.dimension_semantics<arbitrary>], iteration_bounds = array<i64: 16>, scalar_prefetch = 0 : i64, scratch_operands = 1 : i64, tpu.core_type = #tpu.core_type<tc>, window_params = [{transform_indices = @transform_0, window_bounds = array<i64: 1, 8, 32>}, {pipeline_mode = #tpu.pipeline_mode<synchronous>, transform_indices = @transform_1, window_bounds = array<i64: 32, 128>}, {pipeline_mode = #tpu.pipeline_mode<synchronous>, transform_indices = @transform_2, window_bounds = array<i64: 3, 128, 128>}, {pipeline_mode = #tpu.pipeline_mode<synchronous>, transform_indices = @transform_3, window_bounds = array<i64: 3, 8, 128>}, {transform_indices = @transform_4, window_bounds = array<i64: 1, 8, 128>}, {pipeline_mode = #tpu.pipeline_mode<synchronous>, transform_indices = @transform_5, window_bounds = array<i64: 3, 8, 128>}]} {
    %c0_i32 = arith.constant 0 : i32
    %0 = arith.cmpi eq, %arg0, %c0_i32 : i32
    %1 = arith.extui %0 : i1 to i32
    %c0_i32_0 = arith.constant 0 : i32
    %2 = arith.cmpi ne, %1, %c0_i32_0 : i32
    scf.if %2 {
      %c0_42 = arith.constant 0 : index
      %c0_43 = arith.constant 0 : index
      %c0_44 = arith.constant 0 : index
      %53 = vector.load %arg4[%c0_42, %c0_43, %c0_44] : memref<3x8x128xf32, #tpu.memory_space<vmem>>, vector<3x8x128xf32>
      %c0_45 = arith.constant 0 : index
      %c0_46 = arith.constant 0 : index
      %c0_47 = arith.constant 0 : index
      %54 = vector.load %arg7[%c0_45, %c0_46, %c0_47] : memref<3x8x128xf32, #tpu.memory_space<vmem>>, vector<3x8x128xf32>
      tpu.vector_store %arg7[%c0_45, %c0_46, %c0_47], %53 {strides = array<i32>} : memref<3x8x128xf32, #tpu.memory_space<vmem>>, vector<3x8x128xf32>,
    } else {
    }
    %c0 = arith.constant 0 : index
    %c0_1 = arith.constant 0 : index
    %c0_2 = arith.constant 0 : index
    %3 = vector.load %arg1[%c0, %c0_1, %c0_2] : memref<1x8x32xf32, #tpu.memory_space<vmem>>, vector<1x8x32xf32>
    %4 = vector.shape_cast %3 : vector<1x8x32xf32> to vector<8x32xf32>
    %cst = arith.constant 1.000000e+01 : f32
    %5 = vector.broadcast %cst : f32 to vector<8x32xf32>
    %6 = arith.mulf %4, %5 : vector<8x32xf32>
    %c0_3 = arith.constant 0 : index
    %c0_4 = arith.constant 0 : index
    %7 = vector.load %arg2[%c0_3, %c0_4] : memref<32x128xf32, #tpu.memory_space<vmem>>, vector<32x128xf32>
    %cst_5 = arith.constant dense<0.000000e+00> : vector<8x128xf32>
    %8 = tpu.matmul %6, %7, %cst_5 {dimension_numbers = #tpu.dot_dimension_numbers<[1], [0], [0], [1], [0, 0, 1, 1], [], []>} : vector<8x32xf32>, vector<32x128xf32>, vector<8x128xf32> -> vector<8x128xf32>
    %c0_6 = arith.constant 0 : index
    %c0_7 = arith.constant 0 : index
    %c0_8 = arith.constant 0 : index
    %9 = vector.load %arg7[%c0_6, %c0_7, %c0_8] : memref<3x8x128xf32, #tpu.memory_space<vmem>>, vector<1x8x128xf32>
    %10 = vector.shape_cast %9 : vector<1x8x128xf32> to vector<8x128xf32>
    %c0_9 = arith.constant 0 : index
    %c0_10 = arith.constant 0 : index
    %c0_11 = arith.constant 0 : index
    %11 = vector.load %arg3[%c0_9, %c0_10, %c0_11] : memref<3x128x128xf32, #tpu.memory_space<vmem>>, vector<1x128x128xf32>
    %12 = vector.shape_cast %11 : vector<1x128x128xf32> to vector<128x128xf32>
    %cst_12 = arith.constant dense<0.000000e+00> : vector<8x128xf32>
    %13 = tpu.matmul %10, %12, %cst_12 {dimension_numbers = #tpu.dot_dimension_numbers<[1], [0], [0], [1], [0, 0, 1, 1], [], []>} : vector<8x128xf32>, vector<128x128xf32>, vector<8x128xf32> -> vector<8x128xf32>
    %14 = math.tanh %13 : vector<8x128xf32>
    %c0_13 = arith.constant 0 : index
    %c0_14 = arith.constant 0 : index
    %c0_15 = arith.constant 0 : index
    %15 = vector.load %arg7[%c0_13, %c0_14, %c0_15] : memref<3x8x128xf32, #tpu.memory_space<vmem>>, vector<1x8x128xf32>
    %16 = vector.shape_cast %15 : vector<1x8x128xf32> to vector<8x128xf32>
    %17 = vector.shape_cast %14 : vector<8x128xf32> to vector<1x8x128xf32>
    tpu.vector_store %arg7[%c0_13, %c0_14, %c0_15], %17 {strides = array<i32>} : memref<3x8x128xf32, #tpu.memory_space<vmem>>, vector<1x8x128xf32>,
    %18 = arith.addf %8, %14 : vector<8x128xf32>
    %c1 = arith.constant 1 : index
    %c0_16 = arith.constant 0 : index
    %c0_17 = arith.constant 0 : index
    %19 = vector.load %arg7[%c1, %c0_16, %c0_17] : memref<3x8x128xf32, #tpu.memory_space<vmem>>, vector<1x8x128xf32>
    %20 = vector.shape_cast %19 : vector<1x8x128xf32> to vector<8x128xf32>
    %c1_18 = arith.constant 1 : index
    %c0_19 = arith.constant 0 : index
    %c0_20 = arith.constant 0 : index
    %21 = vector.load %arg3[%c1_18, %c0_19, %c0_20] : memref<3x128x128xf32, #tpu.memory_space<vmem>>, vector<1x128x128xf32>
    %22 = vector.shape_cast %21 : vector<1x128x128xf32> to vector<128x128xf32>
    %cst_21 = arith.constant dense<0.000000e+00> : vector<8x128xf32>
    %23 = tpu.matmul %20, %22, %cst_21 {dimension_numbers = #tpu.dot_dimension_numbers<[1], [0], [0], [1], [0, 0, 1, 1], [], []>} : vector<8x128xf32>, vector<128x128xf32>, vector<8x128xf32> -> vector<8x128xf32>
    %24 = math.tanh %23 : vector<8x128xf32>
    %c1_22 = arith.constant 1 : index
    %c0_23 = arith.constant 0 : index
    %c0_24 = arith.constant 0 : index
    %25 = vector.load %arg7[%c1_22, %c0_23, %c0_24] : memref<3x8x128xf32, #tpu.memory_space<vmem>>, vector<1x8x128xf32>
    %26 = vector.shape_cast %25 : vector<1x8x128xf32> to vector<8x128xf32>
    %27 = vector.shape_cast %24 : vector<8x128xf32> to vector<1x8x128xf32>
    tpu.vector_store %arg7[%c1_22, %c0_23, %c0_24], %27 {strides = array<i32>} : memref<3x8x128xf32, #tpu.memory_space<vmem>>, vector<1x8x128xf32>,
    %28 = arith.addf %18, %24 : vector<8x128xf32>
    %c2 = arith.constant 2 : index
    %c0_25 = arith.constant 0 : index
    %c0_26 = arith.constant 0 : index
    %29 = vector.load %arg7[%c2, %c0_25, %c0_26] : memref<3x8x128xf32, #tpu.memory_space<vmem>>, vector<1x8x128xf32>
    %30 = vector.shape_cast %29 : vector<1x8x128xf32> to vector<8x128xf32>
    %c2_27 = arith.constant 2 : index
    %c0_28 = arith.constant 0 : index
    %c0_29 = arith.constant 0 : index
    %31 = vector.load %arg3[%c2_27, %c0_28, %c0_29] : memref<3x128x128xf32, #tpu.memory_space<vmem>>, vector<1x128x128xf32>
    %32 = vector.shape_cast %31 : vector<1x128x128xf32> to vector<128x128xf32>
    %cst_30 = arith.constant dense<0.000000e+00> : vector<8x128xf32>
    %33 = tpu.matmul %30, %32, %cst_30 {dimension_numbers = #tpu.dot_dimension_numbers<[1], [0], [0], [1], [0, 0, 1, 1], [], []>} : vector<8x128xf32>, vector<128x128xf32>, vector<8x128xf32> -> vector<8x128xf32>
    %34 = math.tanh %33 : vector<8x128xf32>
    %c2_31 = arith.constant 2 : index
    %c0_32 = arith.constant 0 : index
    %c0_33 = arith.constant 0 : index
    %35 = vector.load %arg7[%c2_31, %c0_32, %c0_33] : memref<3x8x128xf32, #tpu.memory_space<vmem>>, vector<1x8x128xf32>
    %36 = vector.shape_cast %35 : vector<1x8x128xf32> to vector<8x128xf32>
    %37 = vector.shape_cast %34 : vector<8x128xf32> to vector<1x8x128xf32>
    tpu.vector_store %arg7[%c2_31, %c0_32, %c0_33], %37 {strides = array<i32>} : memref<3x8x128xf32, #tpu.memory_space<vmem>>, vector<1x8x128xf32>,
    %38 = arith.addf %28, %34 : vector<8x128xf32>
    %39 = math.tanh %38 : vector<8x128xf32>
    %cst_34 = arith.constant 1.000000e-01 : f32
    %40 = vector.broadcast %cst_34 : f32 to vector<8x128xf32>
    %41 = arith.addf %39, %40 : vector<8x128xf32>
    %cst_35 = arith.constant 0.000000e+00 : f32
    %42 = vector.broadcast %cst_35 : f32 to vector<8x128xf32>
    %43 = arith.cmpf ogt, %41, %42 : vector<8x128xf32>
    %cst_36 = arith.constant 1.000000e+00 : f32
    %cst_37 = arith.constant 0.000000e+00 : f32
    %44 = vector.broadcast %cst_36 : f32 to vector<8x128xf32>
    %45 = vector.broadcast %cst_37 : f32 to vector<8x128xf32>
    %46 = arith.select %43, %44, %45 : vector<8x128xi1>, vector<8x128xf32>
    %c0_38 = arith.constant 0 : index
    %c0_39 = arith.constant 0 : index
    %c0_40 = arith.constant 0 : index
    %47 = vector.load %arg5[%c0_38, %c0_39, %c0_40] : memref<1x8x128xf32, #tpu.memory_space<vmem>>, vector<1x8x128xf32>
    %48 = vector.shape_cast %47 : vector<1x8x128xf32> to vector<8x128xf32>
    %49 = vector.shape_cast %46 : vector<8x128xf32> to vector<1x8x128xf32>
    tpu.vector_store %arg5[%c0_38, %c0_39, %c0_40], %49 {strides = array<i32>} : memref<1x8x128xf32, #tpu.memory_space<vmem>>, vector<1x8x128xf32>,
    %c15_i32 = arith.constant 15 : i32
    %50 = arith.cmpi eq, %arg0, %c15_i32 : i32
    %51 = arith.extui %50 : i1 to i32
    %c0_i32_41 = arith.constant 0 : i32
    %52 = arith.cmpi ne, %51, %c0_i32_41 : i32
    scf.if %52 {
      %c0_42 = arith.constant 0 : index
      %c0_43 = arith.constant 0 : index
      %c0_44 = arith.constant 0 : index
      %53 = vector.load %arg7[%c0_42, %c0_43, %c0_44] : memref<3x8x128xf32, #tpu.memory_space<vmem>>, vector<3x8x128xf32>
      %c0_45 = arith.constant 0 : index
      %c0_46 = arith.constant 0 : index
      %c0_47 = arith.constant 0 : index
      %54 = vector.load %arg6[%c0_45, %c0_46, %c0_47] : memref<3x8x128xf32, #tpu.memory_space<vmem>>, vector<3x8x128xf32>
      tpu.vector_store %arg6[%c0_45, %c0_46, %c0_47], %53 {strides = array<i32>} : memref<3x8x128xf32, #tpu.memory_space<vmem>>, vector<3x8x128xf32>,
    } else {
    }
    return
  }
  func.func @transform_0(%arg0: i32) -> (i32, i32, i32) {
    %c0_i32 = arith.constant 0 : i32
    %c0_i32_0 = arith.constant 0 : i32
    %c0_i32_1 = arith.constant 0 : i32
    return %arg0, %c0_i32, %c0_i32_0 : i32, i32, i32
  }
  func.func @transform_1(%arg0: i32) -> (i32, i32) {
    %c0_i32 = arith.constant 0 : i32
    %c0_i32_0 = arith.constant 0 : i32
    %c0_i32_1 = arith.constant 0 : i32
    return %c0_i32, %c0_i32_0 : i32, i32
  }
  func.func @transform_2(%arg0: i32) -> (i32, i32, i32) {
    %c0_i32 = arith.constant 0 : i32
    %c0_i32_0 = arith.constant 0 : i32
    %c0_i32_1 = arith.constant 0 : i32
    %c0_i32_2 = arith.constant 0 : i32
    return %c0_i32, %c0_i32_0, %c0_i32_1 : i32, i32, i32
  }
  func.func @transform_3(%arg0: i32) -> (i32, i32, i32) {
    %c0_i32 = arith.constant 0 : i32
    %c0_i32_0 = arith.constant 0 : i32
    %c0_i32_1 = arith.constant 0 : i32
    %c0_i32_2 = arith.constant 0 : i32
    return %c0_i32, %c0_i32_0, %c0_i32_1 : i32, i32, i32
  }
  func.func @transform_4(%arg0: i32) -> (i32, i32, i32) {
    %c0_i32 = arith.constant 0 : i32
    %c0_i32_0 = arith.constant 0 : i32
    %c0_i32_1 = arith.constant 0 : i32
    return %arg0, %c0_i32, %c0_i32_0 : i32, i32, i32
  }
  func.func @transform_5(%arg0: i32) -> (i32, i32, i32) {
    %c0_i32 = arith.constant 0 : i32
    %c0_i32_0 = arith.constant 0 : i32
    %c0_i32_1 = arith.constant 0 : i32
    %c0_i32_2 = arith.constant 0 : i32
    return %c0_i32, %c0_i32_0, %c0_i32_1 : i32, i32, i32
  }
}

</mosaic_0001>

<bundles_post_ra>
// kernel: tpu_custom_call.1
= control target key start
LH: loop header
LB: loop body
LE: loop exit
PB: predicated region body
PF: predicated region fallthrough
CT: control target
= control target key end

     0   :  { %11 = vsyncpa [#allocation4], 0  ;;  %s1756_s0 = inlined_call_operand.hbm [shape: f32[16,8,32], index: 0, kind: input, shape index: {}]   ;;  %s1757_s1 = inlined_call_operand.hbm [shape: f32[32,128], index: 1, kind: input, shape index: {}]   ;;  %s1758_s2 = inlined_call_operand.hbm [shape: f32[3,128,128], index: 2, kind: input, shape index: {}]   ;;  %s1759_s3 = inlined_call_operand.hbm [shape: f32[3,8,128], index: 3, kind: input, shape index: {}]   ;;  %s1760_s4 = inlined_call_operand.hbm [shape: f32[16,8,128], index: 4, kind: output, shape index: {0}]   ;;  %s1761_s5 = inlined_call_operand.hbm [shape: f32[3,8,128], index: 5, kind: output, shape index: {1}]  }
   0x1   :  { %13 = vsyncpa [#allocation4 + $0x1], 0 }
   0x2   :  { %14 = vsyncpa [#allocation7], 0 }
   0x3   :  { %15 = vsyncpa [#allocation10], 0 }
   0x4   :  { %16 = vsyncpa [#allocation5], 0 }
   0x5   :  { %18 = vsyncpa [#allocation5 + $0x1], 0 }
   0x6   :  { %19 = vsyncpa [#allocation13], 0  ;;  %s1433_s18 = smov 0   ;;  %s1435_s19 = smov 0  }
   0x7   :  { %s1437_s20 = smov 0   ;;  %s1439_s21 = smov 0  }
   0x8 LB: > { %s1454_s22 = sadd.s32 4294967295, %s1388_s21   ;;  %s798_s23 = sadd.s32 4294967294, %s1388_s21   ;;  %s1388_s21 = sphi %s1439_s21, %s1789_s21   ;;  %s1384_s20 = sphi %s1437_s20, %s1788_s20   ;;  %s1380_s19 = sphi %s1435_s19, %s1787_s19   ;;  %s1376_s18 = sphi %s1433_s18, %s1786_s18  }
   0x9   : > { %p45_p0 = scmp.ne.s32.totalorder %s1380_s19, %s1376_s18  ;;  %p1762_p1 = scmp.eq.s32.totalorder %s1454_s22, 0 }
   0xa   : > { %p138_p3 = scmp.eq.s32.totalorder %s798_s23, 15  ;;  %p799_p5 = scmp.ge.s32.totalorder %s1388_s21, 1 }
   0xb   : > { %p1463_p4 = por %p1762_p1, %p45_p0  ;;  %p166_p7 = scmp.lt.s32.totalorder %s1388_s21, 17 }
   0xc   : > { %p1468_p6 = por %p138_p3, %p45_p0  ;;  %s1390_s27 = smov [#allocation6]  }
   0xd   : > { %s1765_s24 = scalar_select %p1463_p4, 1, 0 }
   0xe   : > { %s1766_s25 = scalar_select %p1468_p6, 1, 0 }
   0xf   : > { %p1474_p9 = pnand %p799_p5, %p166_p7  ;;  %s178_s28 = sshll.u32 %s1390_s27, 4  ;;  %s1478_s28 = int_to_ptr.vmem [resolvable:$true] %s178_s28 }
  0x10   : > { %s1391_s30 = smov [#allocation8]   ;;  %s1392_s7 = smov [#allocation9]  }
  0x11   : > { %s1767_s26 = scalar_select %p1474_p9, 1, 0 }
  0x12   : > { %p1091_p10 = pneg %p1474_p9  ;;  %s191_s6 = sshll.u32 %s1391_s30, 4  ;;  %s1488_s6 = int_to_ptr.vmem [resolvable:$true] %s191_s6 }
  0x13   : > { %s1490_s8 = sshll.u32 %s1392_s7, 4  ;;  %s1170_s11 = scalar_lea.hbm %s1757_s1, 512  ;;  %s205_s8 = int_to_ptr.vmem [resolvable:$true] %s1490_s8 }
  0x14   : > { %p1484_p11 = pnand %p1091_p10, %p1762_p1  ;;  %p1171_p12 = scmp.ne.s32.totalorder %s1757_s1, %s1170_s11 }
  0x15   : > { %p1177_p5 = scmp.lt.u32.totalorder %s1170_s11, %s1757_s1 }
  0x16   : > { %p1500_p13 = pneg %p1484_p11 }
  0x18   : > { %p1173_p0 = pnand %p1500_p13, %p1171_p12 }
  0x1a   : > { %p1174_p3 = pneg %p1173_p0 }
  0x1c   : > { %p1179_p7 = pnand %p1177_p5, %p1174_p3 }
  0x1e   : > { %1182 = shalt.err (!%p1179_p7)
}
  0x1f   : > { %s1183_s17 = scalar_lea.vmem %s1478_s28, 512  ;;  %p1191_p2 = scmp.lt.s32.totalorder %s1478_s28, %s1478_s28 }
  0x20   : > { %p1184_p10 = scmp.ne.s32.totalorder %s1478_s28, %s1183_s17  ;;  %p1192_p6 = scmp.lt.s32.totalorder %s1183_s17, %s1183_s17 }
  0x22   : > { %p1186_p8 = pnand %p1184_p10, %p1500_p13  ;;  %p1193_p12 = por %p1192_p6, %p1191_p2 }
  0x24   : > { %p1187_p1 = pneg %p1186_p8 }
  0x26   : > { %p1194_p0 = pnand %p1193_p12, %p1187_p1 }
  0x28   : > { %1197 = shalt.err (!%p1194_p0)
}
  0x29   : > { %s1393_s23 = smov 128   ;;  %s1394_s27 = smov 8  }
  0x2a   : > { %1094 = dma.hbm_to_vmem [thread:$0]  (!%p1484_p11), %s1757_s1, 512, %s1478_s28, [#allocation7], %s1393_s23, %s1393_s23, %s1394_s27  }
  0x2b   : > { %s1198_s11 = scalar_lea.hbm %s1758_s2, 6144 }
  0x2c   : > { %p1199_p1 = scmp.ne.s32.totalorder %s1758_s2, %s1198_s11  ;;  %p1205_p8 = scmp.lt.u32.totalorder %s1198_s11, %s1758_s2 }
  0x2e   : > { %p1201_p2 = pnand %p1199_p1, %p1500_p13 }
  0x30   : > { %p1202_p6 = pneg %p1201_p2 }
  0x32   : > { %p1207_p3 = pnand %p1205_p8, %p1202_p6 }
  0x34   : > { %1210 = shalt.err (!%p1207_p3)
}
  0x35   : > { %s1211_s28 = scalar_lea.vmem %s1488_s6, 6144  ;;  %p1219_p12 = scmp.lt.s32.totalorder %s1488_s6, %s1488_s6 }
  0x36   : > { %p1212_p5 = scmp.ne.s32.totalorder %s1488_s6, %s1211_s28  ;;  %p1220_p0 = scmp.lt.s32.totalorder %s1211_s28, %s1211_s28 }
  0x38   : > { %p1214_p7 = pnand %p1212_p5, %p1500_p13  ;;  %p1221_p1 = por %p1220_p0, %p1219_p12 }
  0x3a   : > { %p1215_p10 = pneg %p1214_p7 }
  0x3c   : > { %p1222_p2 = pnand %p1221_p1, %p1215_p10 }
  0x3e   : > { %1225 = shalt.err (!%p1222_p2)
}
  0x3f   : > { %1097 = dma.hbm_to_vmem [thread:$0]  (!%p1484_p11), %s1758_s2, 6144, %s1488_s6, [#allocation7], %s1393_s23, %s1393_s23, %s1394_s27  }
  0x40   : > { %s1226_s10 = scalar_lea.hbm %s1759_s3, 384 }
  0x41   : > { %p1227_p6 = scmp.ne.s32.totalorder %s1759_s3, %s1226_s10  ;;  %p1233_p5 = scmp.lt.u32.totalorder %s1226_s10, %s1759_s3 }
  0x43   : > { %p1229_p8 = pnand %p1227_p6, %p1500_p13 }
  0x45   : > { %p1230_p3 = pneg %p1229_p8 }
  0x47   : > { %p1235_p7 = pnand %p1233_p5, %p1230_p3 }
  0x49   : > { %1238 = shalt.err (!%p1235_p7)
}
  0x4a   : > { %s1239_s16 = scalar_lea.vmem %s205_s8, 384  ;;  %p1247_p1 = scmp.lt.s32.totalorder %s205_s8, %s205_s8 }
  0x4b   : > { %p1240_p10 = scmp.ne.s32.totalorder %s205_s8, %s1239_s16  ;;  %p1248_p2 = scmp.lt.s32.totalorder %s1239_s16, %s1239_s16 }
  0x4d   : > { %p1242_p12 = pnand %p1240_p10, %p1500_p13  ;;  %p1249_p4 = por %p1248_p2, %p1247_p1 }
  0x4f   : > { %p1243_p0 = pneg %p1242_p12 }
  0x51   : > { %p1250_p9 = pnand %p1249_p4, %p1243_p0 }
  0x53   : > { %1253 = shalt.err (!%p1250_p9)
}
  0x54   : > { %1100 = dma.hbm_to_vmem [thread:$0]  (!%p1484_p11), %s1759_s3, 384, %s205_s8, [#allocation10], %s1393_s23, %s1393_s23, %s1394_s27  }
  0x55   : > { %s1573_s14 = sadd.s32 1, %s1388_s21   ;;  %s32_s17 = sadd.s32 1, %s1384_s20 }
  0x56   : > { %s29_s29 = ssub.s32 %s1388_s21, %s1573_s14  ;;  %p39_p9 = scmp.ne.s32.totalorder %s1384_s20, %s1380_s19 }
  0x57   : > { %p30_p4 = scmp.eq.s32.totalorder %s29_s29, 0  ;;  %p40_p13 = scmp.eq.s32.totalorder %s1388_s21, 0 }
  0x58   : > { %p1112_p6 = scmp.lt.s32.totalorder %s1388_s21, 16  ;;  %p1770_p3 = scmp.eq.s32.totalorder %s1454_s22, 15 }
  0x59   : > { %s1583_s30 = scalar_select %p30_p4, %s1384_s20, %s32_s17  }
  0x5a   : > { %p41_p8 = por %p40_p13, %p39_p9  ;;  %p1587_p5 = por %p1770_p3, %p39_p9 }
  0x5b   : > { %s218_s9 = sand.u32 1, %s1384_s20   ;;  %s805_s10 = sshll.u32 %s1388_s21, 7 }
  0x5c   : > { %s804_s8 = sshll.u32 %s218_s9, 3  ;;  %s1596_s11 = scalar_lea.hbm %s1756_s0, %s805_s10 }
  0x5d   : > { %s222_s12 = scalar_lea.vmem [#allocation3], %s804_s8  ;;  %p1598_p11 = pnand %p1112_p6, %p41_p8 }
  0x5e   : > { %s229_s13 = sshll.u32 %s222_s12, 4  ;;  %s219_s16 = scalar_lea.sflag [#allocation4], %s218_s9  ;;  %s1602_s13 = int_to_ptr.vmem [resolvable:$true] %s229_s13 }
  0x5f   : > { %s1254_s6 = scalar_lea.hbm %s1596_s11, 128  ;;  %p1256_p10 = pneg %p1598_p11 }
  0x60   : > { %p1255_p7 = scmp.ne.s32.totalorder %s1596_s11, %s1254_s6  ;;  %s1259_s17 = scalar_lea.hbm %s1756_s0, 2048 }
  0x61   : > { %p1260_p1 = scmp.lt.u32.totalorder %s1596_s11, %s1756_s0  ;;  %p1261_p2 = scmp.lt.u32.totalorder %s1259_s17, %s1254_s6 }
  0x62   : > { %p1257_p12 = pnand %p1256_p10, %p1255_p7  ;;  %p1263_p9 = scmp.lt.u32.totalorder %s1254_s6, %s1596_s11 }
  0x63   : > { %p1262_p4 = por %p1261_p2, %p1260_p1 }
  0x64   : > { %p1258_p0 = pneg %p1257_p12 }
  0x65   : > { %p1264_p13 = por %p1263_p9, %p1262_p4 }
  0x67   : > { %p1265_p6 = pnand %p1264_p13, %p1258_p0 }
  0x69   : > { %1268 = shalt.err (!%p1265_p6)
}
  0x6a   : > { %s1269_s9 = scalar_lea.vmem %s1602_s13, 128  ;;  %s1395_s23 = smov [#allocation3]  }
  0x6b   : > { %p1270_p8 = scmp.ne.s32.totalorder %s1602_s13, %s1269_s9  ;;  %s1274_s27 = sshll.u32 %s1395_s23, 4  ;;  %s1275_s27 = int_to_ptr.vmem [resolvable:$false] %s1274_s27 }
  0x6c   : > { %s1276_s12 = scalar_lea.vmem %s1275_s27, 256  ;;  %p1277_p12 = scmp.lt.s32.totalorder %s1602_s13, %s1275_s27 }
  0x6d   : > { %p1272_p3 = pnand %p1270_p8, %p1256_p10  ;;  %p1278_p1 = scmp.lt.s32.totalorder %s1276_s12, %s1269_s9 }
  0x6f   : > { %p1273_p7 = pneg %p1272_p3  ;;  %p1279_p2 = por %p1278_p1, %p1277_p12 }
  0x71   : > { %p1280_p4 = pnand %p1279_p2, %p1273_p7 }
  0x73   : > { %1283 = shalt.err (!%p1280_p4)
}
  0x74   : > { %1104 = dma.hbm_to_vmem [thread:$0]  (!%p1598_p11), %s1596_s11, 128, %s1602_s13, %s219_s16  }
  0x75   : > { %p1773_p0 = scmp.ne.s32.totalorder %s1767_s26, 0 }
  0x76   : > { %s1632_s6 = sand.u32 (!%p1773_p0), 1, %s1380_s19   ;;  %p1774_p10 = scmp.ne.s32.totalorder (!%p1773_p0), %s1765_s24, 0 }
  0x77   : > { %238 = sbr.rel (%p1773_p0) target bundleno = 504 (0x1f8), region = 36  ;;  %s807_s28 = sshll.u32 (!%p1773_p0), %s1632_s6, 3 }
  0x78   : > { %s241_s29 = scalar_lea.sflag (!%p1773_p0), [#allocation4], %s1632_s6  ;;  %s1636_s17 = scalar_lea.vmem (!%p1773_p0), [#allocation3], %s807_s28 }
  0x7e   : > { %1355 = dma.done.wait (%p1774_p10), %s241_s29, 128  }
  0x7f   : > { %1357 = vsyncadd (%p1774_p10), %s241_s29, 4294967168  ;;  %p1775_p11 = scmp.eq.s32.totalorder %s1454_s22, 0 }
  0x81   : > { %1359 = dma.done.wait (%p1775_p11), [#allocation7], 6656   ;;  %p1776_p9 = pmov %p1775_p11 }
  0x83   : > { %1361 = vsyncadd (%p1776_p9), [#allocation7], 4294960640  ;;  %p1777_p13 = pmov %p1776_p9 }
  0x84   : > { %p1778_p6 = pmov %p1776_p9 }
  0x85   : > { %1363 = dma.done.wait (%p1777_p13), [#allocation10], 384  }
  0x86   : > { %1365 = vsyncadd (%p1778_p6), [#allocation10], 4294966912  ;;  %s1650_s26 = scalar_lea.vmem [#allocation11], %s807_s28  ;;  %p1779_p8 = scmp.ne.s32.totalorder %s1454_s22, 0 }
  0x87   : > { %v287_v0 = vld [vmem:[#allocation9] sm:$0xff] (!%p1779_p8)  ;;  %v288_v1 = vld [vmem:[#allocation9 + $0x8] sm:$0xff] (!%p1779_p8)  ;;  %v289_v2 = vld [vmem:[#allocation9 + $0x10] sm:$0xff] (!%p1779_p8) }
  0x88   : > { %286 = sbr.rel (%p1779_p8) target bundleno = 143 (0x8f), region = 56  ;;  %290 = vst [vmem:[#allocation2] sm:$0xff] (!%p1779_p8), %v287_v0  ;;  %291 = vst [vmem:[#allocation2 + $0x8] sm:$0xff] (!%p1779_p8), %v288_v1 }
  0x89   : > { %292 = vst [vmem:[#allocation2 + $0x10] sm:$0xff] (!%p1779_p8), %v289_v2 }
  0x8f PF: > { %v300_v3 = vld [vmem:[#allocation8] sm:$0xff]  ;;  %v301_v4 = vld [vmem:[#allocation8 + $0x8] sm:$0xff]  ;;  %v1396_v6 = vmov 0.0|0.0   ;;  %v302_v9 = vld [vmem:[#allocation8 + $0x10] sm:$0xff]  ;;  %vm1397_vm0 = vmmov 0   ;;  %v1398_v14 = vmov 0.0  }
  0x90   : > { %v295_v5 = vld [vmem:[#allocation6] sm:$0xff]  ;;  %993 = vmatprep.subr.bf16.mxu0 %v1396_v6  ;;  %1017 = vmatprep.subr.bf16.mxu1 %v1396_v6  ;;  %v994_v7 = vpack.c.bf16 %v301_v4, %v300_v3  ;;  %v296_v8 = vld [vmem:[#allocation6 + $0x8] sm:$0xff]  ;;  %v303_v10 = vld [vmem:[#allocation8 + $0x18] sm:$0xff]  ;;  %vm388_vm1 = vcmask 261120   ;;  %p814_p3 = scmp.ne.s32.totalorder %s1454_s22, 15 }
  0x91   : > { %v1018_v11 = vpack.c.bf16 %v296_v8, %v295_v5  ;;  %v297_v12 = vld [vmem:[#allocation6 + $0x10] sm:$0xff]  ;;  %v298_v13 = vld [vmem:[#allocation6 + $0x18] sm:$0xff]  ;;  %920 = vmatprep.mubr.msk.f32.mxu1 %vm1397_vm0, %v1398_v14  ;;  %909 = vmatprep.mubr.msk.f32.mxu0 %vm1397_vm0, %v1398_v14  ;;  %v997_v15 = vpack.c.bf16 %v303_v10, %v302_v9  ;;  %v304_v17 = vld [vmem:[#allocation8 + $0x20] sm:$0xff] }
  0x92   : > { %995 = vmatpush3.bf16.msra.mxu0 %v994_v7  ;;  %v1021_v16 = vpack.c.bf16 %v298_v13, %v297_v12  ;;  %v305_v18 = vld [vmem:[#allocation8 + $0x28] sm:$0xff]  ;;  %v293_v19 = vld [vmem:[%s1636_s17] sm:$0xff]  ;;  %v465_v20 = vld [vmem:[#allocation8 + $0x80] sm:$0xff] }
  0x93   : > { %1019 = vmatpush3.bf16.msra.mxu1 %v1018_v11  ;;  %996 = vmatprep.subr.bf16.mxu0 %v1396_v6  ;;  %v466_v21 = vld [vmem:[#allocation8 + $0x88] sm:$0xff]  ;;  %v1000_v22 = vpack.c.bf16 %v305_v18, %v304_v17  ;;  %v294_v23 = vmul.f32 10.0, %v293_v19  ;;  %v306_v25 = vld [vmem:[#allocation8 + $0x30] sm:$0xff]  ;;  %v307_v26 = vld [vmem:[#allocation8 + $0x38] sm:$0xff] }
  0x94   : > { %1020 = vmatprep.subr.bf16.mxu1 %v1396_v6  ;;  %v1024_v24 = vpack.c.bf16 %v466_v21, %v465_v20  ;;  %v467_v27 = vld [vmem:[#allocation8 + $0x90] sm:$0xff]  ;;  %v468_v28 = vld [vmem:[#allocation8 + $0x98] sm:$0xff]  ;;  %v1003_v29 = vpack.c.bf16 %v307_v26, %v306_v25  ;;  %v308_v31 = vld [vmem:[#allocation8 + $0x40] sm:$0xff] }
  0x95   : > { %v1027_v30 = vpack.c.bf16 %v468_v28, %v467_v27  ;;  %v309_v32 = vld [vmem:[#allocation8 + $0x48] sm:$0xff]  ;;  %v469_v33 = vld [vmem:[#allocation8 + $0xa0] sm:$0xff]  ;;  %v310_v37 = vld [vmem:[#allocation8 + $0x50] sm:$0xff] }
  0x96   : > { %998 = vmatpush3.bf16.msra.mxu0 %v997_v15  ;;  %v470_v34 = vld [vmem:[#allocation8 + $0xa8] sm:$0xff]  ;;  %v1006_v35 = vpack.c.bf16 %v309_v32, %v308_v31  ;;  %v311_v38 = vld [vmem:[#allocation8 + $0x58] sm:$0xff]  ;;  %v471_v39 = vld [vmem:[#allocation8 + $0xb0] sm:$0xff] }
  0x97   : > { %1022 = vmatpush3.bf16.msra.mxu1 %v1021_v16  ;;  %999 = vmatprep.subr.bf16.mxu0 %v1396_v6  ;;  %v1030_v36 = vpack.c.bf16 %v470_v34, %v469_v33  ;;  %v472_v40 = vld [vmem:[#allocation8 + $0xb8] sm:$0xff]  ;;  %v1009_v41 = vpack.c.bf16 %v311_v38, %v310_v37  ;;  %v312_v43 = vld [vmem:[#allocation8 + $0x60] sm:$0xff]  ;;  %v313_v44 = vld [vmem:[#allocation8 + $0x68] sm:$0xff] }
  0x98   : > { %1023 = vmatprep.subr.bf16.mxu1 %v1396_v6  ;;  %v1033_v42 = vpack.c.bf16 %v472_v40, %v471_v39  ;;  %v473_v45 = vld [vmem:[#allocation8 + $0xc0] sm:$0xff]  ;;  %v474_v46 = vld [vmem:[#allocation8 + $0xc8] sm:$0xff]  ;;  %v1012_v47 = vpack.c.bf16 %v313_v44, %v312_v43  ;;  %v314_v49 = vld [vmem:[#allocation8 + $0x70] sm:$0xff] }
  0x99   : > { %v1036_v48 = vpack.c.bf16 %v474_v46, %v473_v45  ;;  %v315_v50 = vld [vmem:[#allocation8 + $0x78] sm:$0xff]  ;;  %v475_v51 = vld [vmem:[#allocation8 + $0xd0] sm:$0xff]  ;;  %v557_v55 = vld [vmem:[#allocation8 + $0x100] sm:$0xff] }
  0x9a   : > { %1001 = vmatpush3.bf16.msra.mxu0 %v1000_v22  ;;  %921 = vmatmul.mubr.msk.f32.vlgmr.msra.gmra.mrb[0].mxu1 %vm388_vm1, %v294_v23  ;;  %v476_v52 = vld [vmem:[#allocation8 + $0xd8] sm:$0xff]  ;;  %v1015_v53 = vpack.c.bf16 %v315_v50, %v314_v49  ;;  %v558_v56 = vld [vmem:[#allocation8 + $0x108] sm:$0xff]  ;;  %v477_v57 = vld [vmem:[#allocation8 + $0xe0] sm:$0xff] }
  0x9b   : > { %1025 = vmatpush3.bf16.msra.mxu1 %v1024_v24  ;;  %1002 = vmatprep.subr.bf16.mxu0 %v1396_v6  ;;  %v1039_v54 = vpack.c.bf16 %v476_v52, %v475_v51  ;;  %v478_v58 = vld [vmem:[#allocation8 + $0xe8] sm:$0xff]  ;;  %v299_v59 = vld [vmem:[#allocation2] sm:$0xff]  ;;  %v1048_v60 = vpack.c.bf16 %v558_v56, %v557_v55  ;;  %v559_v62 = vld [vmem:[#allocation8 + $0x110] sm:$0xff] }
  0x9c   : > { %1026 = vmatprep.subr.bf16.mxu1 %v1396_v6  ;;  %955 = vmatprep.mubr.msk.f32.mxu1 %vm1397_vm0, %v1398_v14  ;;  %v1042_v61 = vpack.c.bf16 %v478_v58, %v477_v57  ;;  %v560_v63 = vld [vmem:[#allocation8 + $0x118] sm:$0xff]  ;;  %v479_v0 = vld [vmem:[#allocation8 + $0xf0] sm:$0xff]  ;;  %v561_v4 = vld [vmem:[#allocation8 + $0x120] sm:$0xff] }
  0x9d   : > { %v480_v1 = vld [vmem:[#allocation8 + $0xf8] sm:$0xff]  ;;  %v1051_v2 = vpack.c.bf16 %v560_v63, %v559_v62  ;;  %v562_v5 = vld [vmem:[#allocation8 + $0x128] sm:$0xff]  ;;  %v463_v8 = vld [vmem:[#allocation2 + $0x8] sm:$0xff] }
  0x9e   : > { %1004 = vmatpush3.bf16.msra.mxu0 %v1003_v29  ;;  %v1045_v3 = vpack.c.bf16 %v480_v1, %v479_v0  ;;  %v1054_v7 = vpack.c.bf16 %v562_v5, %v561_v4  ;;  %v563_v9 = vld [vmem:[#allocation8 + $0x130] sm:$0xff]  ;;  %v564_v10 = vld [vmem:[#allocation8 + $0x138] sm:$0xff]  ;;  %v565_v12 = vld [vmem:[#allocation8 + $0x140] sm:$0xff] }
  0x9f   : > { %1028 = vmatpush3.bf16.msra.mxu1 %v1027_v30  ;;  %1005 = vmatprep.subr.bf16.mxu0 %v1396_v6  ;;  %v1057_v11 = vpack.c.bf16 %v564_v10, %v563_v9  ;;  %v566_v13 = vld [vmem:[#allocation8 + $0x148] sm:$0xff]  ;;  %v567_v16 = vld [vmem:[#allocation8 + $0x150] sm:$0xff]  ;;  %v568_v17 = vld [vmem:[#allocation8 + $0x158] sm:$0xff] }
  0xa0   : > { %1029 = vmatprep.subr.bf16.mxu1 %v1396_v6  ;;  %v1060_v15 = vpack.c.bf16 %v566_v13, %v565_v12  ;;  %v1063_v18 = vpack.c.bf16 %v568_v17, %v567_v16  ;;  %v569_v19 = vld [vmem:[#allocation8 + $0x160] sm:$0xff]  ;;  %v570_v20 = vld [vmem:[#allocation8 + $0x168] sm:$0xff]  ;;  %v571_v22 = vld [vmem:[#allocation8 + $0x170] sm:$0xff] }
  0xa1   : > { %v1066_v21 = vpack.c.bf16 %v570_v20, %v569_v19  ;;  %v572_v23 = vld [vmem:[#allocation8 + $0x178] sm:$0xff]  ;;  %v555_v25 = vld [vmem:[#allocation2 + $0x10] sm:$0xff] }
  0xa2   : > { %1007 = vmatpush3.bf16.msra.mxu0 %v1006_v35  ;;  %v1069_v24 = vpack.c.bf16 %v572_v23, %v571_v22 }
  0xa3   : > { %1031 = vmatpush3.bf16.msra.mxu1 %v1030_v36  ;;  %1008 = vmatprep.subr.bf16.mxu0 %v1396_v6 }
  0xa4   : > { %1032 = vmatprep.subr.bf16.mxu1 %v1396_v6 }
  0xa6   : > { %1010 = vmatpush3.bf16.msra.mxu0 %v1009_v41 }
  0xa7   : > { %1034 = vmatpush3.bf16.msra.mxu1 %v1033_v42  ;;  %1011 = vmatprep.subr.bf16.mxu0 %v1396_v6 }
  0xa8   : > { %1035 = vmatprep.subr.bf16.mxu1 %v1396_v6 }
  0xaa   : > { %1013 = vmatpush3.bf16.msra.mxu0 %v1012_v47 }
  0xab   : > { %1037 = vmatpush3.bf16.msra.mxu1 %v1036_v48  ;;  %1014 = vmatprep.subr.bf16.mxu0 %v1396_v6 }
  0xac   : > { %1038 = vmatprep.subr.bf16.mxu1 %v1396_v6 }
  0xae   : > { %1016 = vmatpush3.bf16.msra.mxu0 %v1015_v53 }
  0xaf   : > { %1040 = vmatpush3.bf16.msra.mxu1 %v1039_v54  ;;  %1047 = vmatprep.subr.bf16.mxu0 %v1396_v6 }
  0xb0   : > { %1041 = vmatprep.subr.bf16.mxu1 %v1396_v6 }
  0xb1   : > { %910 = vmatmul.mubr.f32.vlgmr.msra.gmra.mrb[0].mxu0 %v299_v59 }
  0xb2   : > { %1049 = vmatpush3.bf16.msra.mxu0 %v1048_v60  ;;  %990 = vmatprep.mubr.msk.f32.mxu0 %vm1397_vm0, %v1398_v14 }
  0xb3   : > { %1043 = vmatpush3.bf16.msra.mxu1 %v1042_v61  ;;  %1050 = vmatprep.subr.bf16.mxu0 %v1396_v6 }
  0xb4   : > { %1044 = vmatprep.subr.bf16.mxu1 %v1396_v6 }
  0xb6   : > { %1052 = vmatpush3.bf16.msra.mxu0 %v1051_v2 }
  0xb7   : > { %1046 = vmatpush3.bf16.msra.mxu1 %v1045_v3  ;;  %1053 = vmatprep.subr.bf16.mxu0 %v1396_v6 }
  0xba   : > { %956 = vmatmul.mubr.f32.vlgmr.msra.gmra.mrb[2].mxu1 %v463_v8  ;;  %1055 = vmatpush3.bf16.msra.mxu0 %v1054_v7 }
  0xbb   : > { %1056 = vmatprep.subr.bf16.mxu0 %v1396_v6 }
  0xbe   : > { %1058 = vmatpush3.bf16.msra.mxu0 %v1057_v11 }
  0xbf   : > { %1059 = vmatprep.subr.bf16.mxu0 %v1396_v6 }
  0xc2   : > { %1061 = vmatpush3.bf16.msra.mxu0 %v1060_v15 }
  0xc3   : > { %1062 = vmatprep.subr.bf16.mxu0 %v1396_v6 }
  0xc6   : > { %1064 = vmatpush3.bf16.msra.mxu0 %v1063_v18 }
  0xc7   : > { %1065 = vmatprep.subr.bf16.mxu0 %v1396_v6 }
  0xca   : > { %1067 = vmatpush3.bf16.msra.mxu0 %v1066_v21 }
  0xcb   : > { %1068 = vmatprep.subr.bf16.mxu0 %v1396_v6 }
  0xce   : > { %1070 = vmatpush3.bf16.msra.mxu0 %v1069_v24 }
  0xd1   : > { %991 = vmatmul.mubr.f32.vlgmr.msra.gmra.mrb[2].mxu0 %v555_v25 }
 0x16d   : > { %v458_v26 = vpop.f32.mrb[0].mxu1 }
 0x16e   : > { %v922_v27 = vpop.f32.mrb[1].mxu1 }
 0x184   : > { %v382_v28 = vpop.f32.mrb[0].mxu0 }
 0x185   : > { %1162 = vtanh.f32 %v382_v28  ;;  %v911_v29 = vpop.f32.mrb[1].mxu0 }
 0x18d   : > { %v547_v30 = vpop.f32.mrb[2].mxu1 }
 0x18e   : > { %1164 = vtanh.f32 %v547_v30  ;;  %v957_v31 = vpop.f32.mrb[3].mxu1 }
 0x18f   : > { %v1163_v32 = vpop.eup %1162 }
 0x190   : > { %387 = vst [vmem:[#allocation2] sm:$0xff] %v1163_v32  ;;  %v459_v33 = vadd.f32 %v1163_v32, %v458_v26 }
 0x197   : > { %v655_v42 = vld [vmem:[#allocation2] sm:$0xff] (!%p814_p3) }
 0x198   : > { %v1165_v34 = vpop.eup %1164  ;;  %658 = vst [vmem:[#allocation12] sm:$0xff] (!%p814_p3), %v655_v42 }
 0x199   : > { %552 = vst [vmem:[#allocation2 + $0x8] sm:$0xff] %v1165_v34  ;;  %v553_v35 = vadd.f32 %v1165_v34, %v459_v33 }
 0x1a0   : > { %v656_v43 = vld [vmem:[#allocation2 + $0x8] sm:$0xff] (!%p814_p3) }
 0x1a1   : > { %659 = vst [vmem:[#allocation12 + $0x8] sm:$0xff] (!%p814_p3), %v656_v43 }
 0x1a4   : > { %v639_v36 = vpop.f32.mrb[2].mxu0 }
 0x1a5   : > { %1166 = vtanh.f32 %v639_v36  ;;  %v992_v6 = vpop.f32.mrb[3].mxu0 }
 0x1af   : > { %v1167_v37 = vpop.eup %1166 }
 0x1b0   : > { %644 = vst [vmem:[#allocation2 + $0x10] sm:$0xff] %v1167_v37  ;;  %v645_v38 = vadd.f32 %v1167_v37, %v553_v35 }
 0x1b2   : > { %1168 = vtanh.f32 %v645_v38 }
 0x1b7   : > { %v657_v44 = vld [vmem:[#allocation2 + $0x10] sm:$0xff] (!%p814_p3) }
 0x1b8   : > { %660 = vst [vmem:[#allocation12 + $0x10] sm:$0xff] (!%p814_p3), %v657_v44 }
 0x1bb   : > { %654 = sbr.rel (%p814_p3) target bundleno = 450 (0x1c2), region = 60 }
 0x1bc   : > { %v1169_v39 = vpop.eup %1168 }
 0x1bd   : > { %v647_v40 = vadd.f32 0.1, %v1169_v39 }
 0x1bf   : > { %vm648_vm2 = vcmp.gt.f32.partialorder %v647_v40, 0.0 }
 0x1c0   : > { %v649_v41 = vsel %vm648_vm2, 1.0, %v1398_v14 }
 0x1c1   : > { %650 = vst [vmem:[%s1650_s26] sm:$0xff] %v649_v41 }
 0x1c2 PF: > { %s816_s24 = sshll.u32 %s1454_s22, 7  ;;  %s675_s16 = sshll.u32 %s1650_s26, 4  ;;  %s676_s16 = int_to_ptr.vmem [resolvable:$true] %s675_s16 }
 0x1c3   : > { %s1696_s15 = scalar_lea.hbm %s1760_s4, %s816_s24  ;;  %s662_s10 = scalar_lea.sflag [#allocation5], %s1632_s6 }
 0x1c4   : > { %s1284_s8 = scalar_lea.vmem %s676_s16, 128  ;;  %s1399_s9 = smov [#allocation11]  }
 0x1c5   : > { %p1285_p7 = scmp.ne.s32.totalorder %s676_s16, %s1284_s8  ;;  %s1288_s23 = sshll.u32 %s1399_s9, 4  ;;  %s1289_s23 = int_to_ptr.vmem [resolvable:$false] %s1288_s23 }
 0x1c6   : > { %s1290_s27 = scalar_lea.vmem %s1289_s23, 256  ;;  %p1291_p2 = scmp.lt.s32.totalorder %s676_s16, %s1289_s23 }
 0x1c7   : > { %p1286_p12 = pnand %p1285_p7, %p1587_p5  ;;  %p1292_p4 = scmp.lt.s32.totalorder %s1290_s27, %s1284_s8 }
 0x1c9   : > { %p1287_p1 = pneg %p1286_p12  ;;  %p1293_p0 = por %p1292_p4, %p1291_p2 }
 0x1cb   : > { %p1294_p10 = pnand %p1293_p0, %p1287_p1 }
 0x1cd   : > { %1297 = shalt.err (!%p1294_p10)
}
 0x1ce   : > { %s1298_s12 = scalar_lea.hbm %s1696_s15, 128  ;;  %s1302_s29 = scalar_lea.hbm %s1760_s4, 2048 }
 0x1cf   : > { %p1299_p11 = scmp.ne.s32.totalorder %s1696_s15, %s1298_s12  ;;  %p1303_p6 = scmp.lt.u32.totalorder %s1696_s15, %s1760_s4 }
 0x1d0   : > { %p1304_p8 = scmp.lt.u32.totalorder %s1302_s29, %s1298_s12  ;;  %p1306_p7 = scmp.lt.u32.totalorder %s1298_s12, %s1696_s15 }
 0x1d1   : > { %p1300_p9 = pnand %p1299_p11, %p1587_p5 }
 0x1d2   : > { %p1305_p3 = por %p1304_p8, %p1303_p6 }
 0x1d3   : > { %p1301_p13 = pneg %p1300_p9 }
 0x1d4   : > { %p1307_p12 = por %p1306_p7, %p1305_p3 }
 0x1d6   : > { %p1308_p1 = pnand %p1307_p12, %p1301_p13 }
 0x1d8   : > { %1311 = shalt.err (!%p1308_p1)
}
 0x1d9   : > { %1085 = dma.vmem_to_hbm [thread:$0]  (%p1587_p5), %s676_s16, 128, %s1696_s15, %s662_s10  }
 0x1da   : > { %s1400_s24 = smov [#allocation12]   ;;  %p1780_p4 = scmp.eq.s32.totalorder %s1454_s22, 15 }
 0x1db   : > { %s685_s11 = sshll.u32 %s1400_s24, 4  ;;  %s686_s11 = int_to_ptr.vmem [resolvable:$true] %s685_s11 }
 0x1dc   : > { %s1312_s13 = scalar_lea.vmem %s686_s11, 384  ;;  %p1319_p11 = scmp.lt.s32.totalorder %s686_s11, %s686_s11 }
 0x1dd   : > { %p1313_p2 = scmp.ne.s32.totalorder %s686_s11, %s1312_s13  ;;  %p1320_p9 = scmp.lt.s32.totalorder %s1312_s13, %s1312_s13 }
 0x1df   : > { %p1314_p0 = pnand %p1313_p2, %p1780_p4  ;;  %p1321_p6 = por %p1320_p9, %p1319_p11 }
 0x1e1   : > { %p1315_p10 = pneg %p1314_p0 }
 0x1e3   : > { %p1322_p8 = pnand %p1321_p6, %p1315_p10 }
 0x1e5   : > { %1325 = shalt.err (!%p1322_p8)
}
 0x1e6   : > { %s1326_s7 = scalar_lea.hbm %s1761_s5, 384  ;;  %p1781_p13 = pmov %p1780_p4 }
 0x1e7   : > { %p1327_p5 = scmp.ne.s32.totalorder %s1761_s5, %s1326_s7  ;;  %p1332_p12 = scmp.lt.u32.totalorder %s1326_s7, %s1761_s5 }
 0x1e9   : > { %p1328_p3 = pnand %p1327_p5, %p1781_p13 }
 0x1eb   : > { %p1329_p7 = pneg %p1328_p3 }
 0x1ed   : > { %p1334_p1 = pnand %p1332_p12, %p1329_p7 }
 0x1ef   : > { %1337 = shalt.err (!%p1334_p1)
}
 0x1f0   : > { %s1401_s27 = smov 128   ;;  %s1402_s12 = smov 8  }
 0x1f1   : > { %p1782_p2 = pmov %p1780_p4 }
 0x1f3   : > { %1087 = dma.vmem_to_hbm [thread:$0]  (%p1782_p2), %s686_s11, 384, %s1761_s5, [#allocation13], %s1401_s27, %s1401_s27, %s1402_s12  }
 0x1f4   : > { %p1783_p4 = pmov %p1782_p2 }
 0x1f5   : > { %p1784_p0 = pmov %p1782_p2 }
 0x1f6   : > { %1367 = dma.done.wait (%p1783_p4), [#allocation13], 384  }
 0x1f7   : > { %1369 = vsyncadd (%p1784_p0), [#allocation13], 4294966912 }
 0x1f8 PF: > { %p1118_p10 = scmp.ge.s32.totalorder %s1388_s21, 2  ;;  %s704_s29 = sand.u32 1, %s1376_s18  }
 0x1f9   : > { %p1785_p11 = scmp.ne.s32.totalorder %s1766_s25, 0  ;;  %s705_s17 = scalar_lea.sflag [#allocation5], %s704_s29 }
 0x1fb   : > { %p1106_p9 = pnand %p1118_p10, %p1785_p11 }
 0x1fd   : > { %1371 = dma.done.wait (!%p1106_p9), %s705_s17, 128  }
 0x1fe   : > { %1373 = vsyncadd (!%p1106_p9), %s705_s17, 4294967168  ;;  %p22_p6 = scmp.ge.s32.totalorder %s1573_s14, 18   ;;  %s1786_s18 = smov %s1380_s19 }
 0x1ff   : > { %s1787_s19 = smov %s1384_s20  ;;  %s1788_s20 = smov %s1583_s30 }
 0x200   : > { %s1789_s21 = smov %s1573_s14  ;;  %24 = sbr.rel (!%p22_p6) target bundleno = 8 (0x8), region = 113 }
 0x207   :  { %710 = vsyncpa [#allocation4], 1 }
 0x208   :  { %712 = vsyncpa [#allocation4 + $0x1], 1 }
 0x209   :  { %713 = vsyncpa [#allocation7], 1 }
 0x20a   :  { %714 = vsyncpa [#allocation10], 1 }
 0x20b   :  { %715 = vsyncpa [#allocation5], 1 }
 0x20c   :  { %717 = vsyncpa [#allocation5 + $0x1], 1 }
 0x20d   :  { %718 = vsyncpa [#allocation13], 1 }

</bundles_post_ra>
